<compile_context>
chip_gen: v7x
topology: tpu7x:2x2x1
jax: 0.10.0
libtpu: 0.0.40
codegen_flags: <defaults>
</compile_context>

<pallas_src>
import jax
import jax.numpy as jnp
from jax.experimental import pallas as pl
from jax.experimental.pallas import tpu as pltpu


# ----------------------------- Pallas kernel ------------------------------ #

def uv_encoder_kernel(nodes_ref, neigh_ref, wt_ref, wn_ref, b_ref, o_ref):
    """relu(onehot(nodes) @ Wt + counts(neigh) @ Wn + b) for one batch tile.

    nodes_ref : (TB, 1)   int32  query node ids for this batch tile
    neigh_ref : (TB, K)   int32  neighbor ids for this batch tile
    wt_ref    : (Nn, Dp)  f32    table @ W[:D]      (self path, resident)
    wn_ref    : (Nn, Dp)  f32    table @ W[D:] / K  (mean-pool path, resident)
    b_ref     : (1, Dp)   f32    Linear bias, lane-padded (resident)
    o_ref     : (TB, Dp)  f32    output tile (lane-dense)
    """
    tb = nodes_ref.shape[0]
    n_nodes = wt_ref.shape[0]
    k_neigh = neigh_ref.shape[1]
    hi = jax.lax.Precision.HIGHEST

    node_iota = jax.lax.broadcasted_iota(jnp.int32, (tb, n_nodes), 1)

    # One-hot selector for the self-embedding and neighbor multiplicity counts.
    onehot_self = (nodes_ref[...] == node_iota).astype(jnp.float32)      # (TB, Nn)
    neigh_ids = neigh_ref[...]                                           # (TB, K)
    counts = (neigh_ids[:, 0:1] == node_iota).astype(jnp.float32)
    for k in range(1, k_neigh):                                          # K small & static
        counts = counts + (neigh_ids[:, k:k + 1] == node_iota).astype(jnp.float32)

    # Gather dots: 0/1 / small-int LHS selecting rows of the folded weights.
    # HIGHEST is kept here (and only here) so the row selection is exact f32.
    acc = jnp.dot(onehot_self, wt_ref[...],
                  preferred_element_type=jnp.float32, precision=hi)
    acc = acc + jnp.dot(counts, wn_ref[...],
                        preferred_element_type=jnp.float32, precision=hi)
    acc = acc + b_ref[...]
    o_ref[...] = jnp.maximum(acc, 0.0).astype(o_ref.dtype)


# --------------------------------- wrapper --------------------------------- #

def _round_up(x, m):
    return ((x + m - 1) // m) * m


def uv_encoder_pallas(nodes, neighbor_idx, features_weight, weight, bias):
    """relu(cat([E[nodes], mean_k E[neigh[:,k]]], 1) @ weight + bias), fused."""
    batch = nodes.shape[0]
    n_nodes, d = features_weight.shape
    k_neigh = neighbor_idx.shape[1]
    assert weight.shape == (2 * d, d)

    hi = jax.lax.Precision.HIGHEST

    # Lane-dense output: pad the Linear output dim to a multiple of 128 with
    # zero columns / zero bias so stores are unmasked vst; slice back after.
    dp = max(128, _round_up(d, 128))
    w_pad = jnp.pad(weight, ((0, 0), (0, dp - d))) if dp != d else weight
    b_pad = jnp.pad(bias, (0, dp - d)) if dp != d else bias

    # Fold the embedding table into the Linear weights (one-time, amortized
    # over the batch):  out = onehot_self @ (E @ W_top) + counts @ (E @ W_bot / K).
    wt = jnp.dot(features_weight, w_pad[:d, :], precision=hi)                 # (Nn, Dp)
    wn = jnp.dot(features_weight, w_pad[d:, :], precision=hi) / float(k_neigh)
    bias2d = b_pad.reshape(1, dp)

    nodes2d = nodes.reshape(batch, 1).astype(jnp.int32)
    neigh2d = neighbor_idx.astype(jnp.int32)

    # Batch tiling: one full-height step for small batches (full-dim blocks
    # are exempt from the (8,128) rule); 256-row tiles otherwise (fills the
    # MXU M dimension on v6e/v7x; still fine on v5e).
    tb = batch if batch <= 256 else 256
    padded_b = _round_up(batch, tb)
    num_tiles = padded_b // tb
    if num_tiles > 1 and num_tiles % 2 == 1:
        # Even tile count so ("parallel",) splits evenly across v7x's 2 TCs.
        num_tiles += 1
        padded_b += tb
    if padded_b != batch:
        pad_rows = padded_b - batch
        nodes2d = jnp.pad(nodes2d, ((0, pad_rows), (0, 0)))   # id 0 is valid; rows discarded
        neigh2d = jnp.pad(neigh2d, ((0, pad_rows), (0, 0)))

    # Constant-index residents: single-buffer them when there is an actual
    # multi-step pipeline (halves their VMEM footprint; matters on v7x 64 MiB).
    resident_kwargs = dict(pipeline_mode=pl.Buffered(1)) if num_tiles > 1 else {}

    # Explicit scoped-VMEM budget (v5e default is only 16 MiB): residents +
    # double-buffered id/output tiles, with headroom; capped below v7x's 64 MiB/TC.
    resident_bytes = (2 * n_nodes * dp + 8 * dp) * 4
    tile_bytes = (tb * 128 * 2 + tb * dp) * 4
    vmem_limit = int(min(60 << 20, max(16 << 20, 2 * resident_bytes + 4 * tile_bytes + (2 << 20))))

    out = pl.pallas_call(
        uv_encoder_kernel,
        out_shape=jax.ShapeDtypeStruct((padded_b, dp), features_weight.dtype),
        grid_spec=pltpu.PrefetchScalarGridSpec(
            num_scalar_prefetch=0,
            grid=(num_tiles,),
            in_specs=[
                pl.BlockSpec((tb, 1), lambda i: (i, 0)),            # node ids
                pl.BlockSpec((tb, k_neigh), lambda i: (i, 0)),      # neighbor ids
                pl.BlockSpec((n_nodes, dp), lambda i: (0, 0), **resident_kwargs),  # Wt
                pl.BlockSpec((n_nodes, dp), lambda i: (0, 0), **resident_kwargs),  # Wn
                pl.BlockSpec((1, dp), lambda i: (0, 0), **resident_kwargs),        # bias
            ],
            out_specs=pl.BlockSpec((tb, dp), lambda i: (i, 0)),
        ),
        compiler_params=pltpu.CompilerParams(
            dimension_semantics=("parallel",),
            vmem_limit_bytes=vmem_limit),
    )(nodes2d, neigh2d, wt, wn, bias2d)

    return out[:batch, :d]


# ------------------------------- reference --------------------------------- #

def uv_encoder_reference(nodes, neighbor_idx, features_weight, weight, bias):
    # TODO(synk): the real GraphRec UV_Aggregator (attention-weighted over
    # (item, rating) pairs) is an external module passed to UV_Encoder; a
    # mean-pool aggregator stands in here (and assumes all K neighbor ids are
    # valid, i.e. no sentinel-padded neighbor lists).
    self_feats = features_weight[nodes]
    neigh_feats = jnp.mean(features_weight[neighbor_idx], axis=1)
    combined = jnp.concatenate([self_feats, neigh_feats], axis=1)
    pre = jnp.dot(combined, weight, precision=jax.lax.Precision.HIGHEST) + bias
    return jax.nn.relu(pre)


# --------------------------------- main ------------------------------------ #

if __name__ == "__main__":
    key = jax.random.PRNGKey(0)
    k_feat, k_w, k_b, k_nodes, k_neigh = jax.random.split(key, 5)

    num_nodes_total = 32    # embedding table size
    embed_dim = 64          # D
    batch = 24              # B  -> single grid step (TB = 24)
    num_neighbors = 5       # K

    # Shapes from the module __init__:
    #   features: nn.Embedding(num_nodes_total, embed_dim)
    #   linear1:  nn.Linear(2*embed_dim, embed_dim)   (stored here as [in, out])
    features_weight = jax.random.normal(
        k_feat, (num_nodes_total, embed_dim), dtype=jnp.float32) * 0.1
    bound = 1.0 / float(jnp.sqrt(2.0 * embed_dim))
    weight = jax.random.uniform(
        k_w, (2 * embed_dim, embed_dim), dtype=jnp.float32,
        minval=-bound, maxval=bound)
    bias = jax.random.uniform(
        k_b, (embed_dim,), dtype=jnp.float32, minval=-bound, maxval=bound)

    nodes = jax.random.randint(k_nodes, (batch,), 0, num_nodes_total)
    neighbor_idx = jax.random.randint(
        k_neigh, (batch, num_neighbors), 0, num_nodes_total)

    out = uv_encoder_pallas(nodes, neighbor_idx, features_weight, weight, bias)
    out = jax.block_until_ready(out)

    ref = uv_encoder_reference(nodes, neighbor_idx, features_weight, weight, bias)
    assert out.shape == (batch, embed_dim)
    max_diff = float(jnp.max(jnp.abs(out - ref)))
    assert jnp.allclose(out, ref, atol=2e-5, rtol=2e-5), \
        f"mismatch vs reference (max abs diff {max_diff})"

    print("KERNEL_OK")
</pallas_src>

<mosaic_0001>
module attributes {stable_mosaic.version = 11 : i64} {
  func.func @uv_encoder_kernel(%arg0: i32, %arg1: memref<24x1xi32, #tpu.memory_space<vmem>>, %arg2: memref<24x5xi32, #tpu.memory_space<vmem>>, %arg3: memref<32x128xf32, #tpu.memory_space<vmem>>, %arg4: memref<32x128xf32, #tpu.memory_space<vmem>>, %arg5: memref<1x128xf32, #tpu.memory_space<vmem>>, %arg6: memref<24x128xf32, #tpu.memory_space<vmem>>) attributes {dimension_semantics = [#tpu.dimension_semantics<parallel>], iteration_bounds = array<i64: 1>, scalar_prefetch = 0 : i64, scratch_operands = 0 : i64, tpu.core_type = #tpu.core_type<tc>, window_params = [{transform_indices = @transform_0, window_bounds = array<i64: 24, 1>}, {transform_indices = @transform_1, window_bounds = array<i64: 24, 5>}, {pipeline_mode = #tpu.pipeline_mode<synchronous>, transform_indices = @transform_2, window_bounds = array<i64: 32, 128>}, {pipeline_mode = #tpu.pipeline_mode<synchronous>, transform_indices = @transform_3, window_bounds = array<i64: 32, 128>}, {pipeline_mode = #tpu.pipeline_mode<synchronous>, transform_indices = @transform_4, window_bounds = array<i64: 1, 128>}, {transform_indices = @transform_5, window_bounds = array<i64: 24, 128>}]} {
    %0 = tpu.iota {dimensions = array<i32: 1>} : vector<24x32xi32>
    %c0 = arith.constant 0 : index
    %c0_0 = arith.constant 0 : index
    %1 = vector.load %arg1[%c0, %c0_0] : memref<24x1xi32, #tpu.memory_space<vmem>>, vector<24x1xi32>
    %2 = vector.broadcast %1 : vector<24x1xi32> to vector<24x32xi32>
    %3 = arith.cmpi eq, %2, %0 : vector<24x32xi32>
    %4 = arith.extui %3 : vector<24x32xi1> to vector<24x32xi32>
    %5 = arith.sitofp %4 : vector<24x32xi32> to vector<24x32xf32>
    %c0_1 = arith.constant 0 : index
    %c0_2 = arith.constant 0 : index
    %6 = vector.load %arg2[%c0_1, %c0_2] : memref<24x5xi32, #tpu.memory_space<vmem>>, vector<24x5xi32>
    %7 = vector.extract_strided_slice %6 {offsets = [0, 0], sizes = [24, 1], strides = [1, 1]} : vector<24x5xi32> to vector<24x1xi32>
    %8 = vector.broadcast %7 : vector<24x1xi32> to vector<24x32xi32>
    %9 = arith.cmpi eq, %8, %0 : vector<24x32xi32>
    %10 = arith.extui %9 : vector<24x32xi1> to vector<24x32xi32>
    %11 = arith.sitofp %10 : vector<24x32xi32> to vector<24x32xf32>
    %12 = vector.extract_strided_slice %6 {offsets = [0, 1], sizes = [24, 1], strides = [1, 1]} : vector<24x5xi32> to vector<24x1xi32>
    %13 = vector.broadcast %12 : vector<24x1xi32> to vector<24x32xi32>
    %14 = arith.cmpi eq, %13, %0 : vector<24x32xi32>
    %15 = arith.extui %14 : vector<24x32xi1> to vector<24x32xi32>
    %16 = arith.sitofp %15 : vector<24x32xi32> to vector<24x32xf32>
    %17 = arith.addf %11, %16 : vector<24x32xf32>
    %18 = vector.extract_strided_slice %6 {offsets = [0, 2], sizes = [24, 1], strides = [1, 1]} : vector<24x5xi32> to vector<24x1xi32>
    %19 = vector.broadcast %18 : vector<24x1xi32> to vector<24x32xi32>
    %20 = arith.cmpi eq, %19, %0 : vector<24x32xi32>
    %21 = arith.extui %20 : vector<24x32xi1> to vector<24x32xi32>
    %22 = arith.sitofp %21 : vector<24x32xi32> to vector<24x32xf32>
    %23 = arith.addf %17, %22 : vector<24x32xf32>
    %24 = vector.extract_strided_slice %6 {offsets = [0, 3], sizes = [24, 1], strides = [1, 1]} : vector<24x5xi32> to vector<24x1xi32>
    %25 = vector.broadcast %24 : vector<24x1xi32> to vector<24x32xi32>
    %26 = arith.cmpi eq, %25, %0 : vector<24x32xi32>
    %27 = arith.extui %26 : vector<24x32xi1> to vector<24x32xi32>
    %28 = arith.sitofp %27 : vector<24x32xi32> to vector<24x32xf32>
    %29 = arith.addf %23, %28 : vector<24x32xf32>
    %30 = vector.extract_strided_slice %6 {offsets = [0, 4], sizes = [24, 1], strides = [1, 1]} : vector<24x5xi32> to vector<24x1xi32>
    %31 = vector.broadcast %30 : vector<24x1xi32> to vector<24x32xi32>
    %32 = arith.cmpi eq, %31, %0 : vector<24x32xi32>
    %33 = arith.extui %32 : vector<24x32xi1> to vector<24x32xi32>
    %34 = arith.sitofp %33 : vector<24x32xi32> to vector<24x32xf32>
    %35 = arith.addf %29, %34 : vector<24x32xf32>
    %c0_3 = arith.constant 0 : index
    %c0_4 = arith.constant 0 : index
    %36 = vector.load %arg3[%c0_3, %c0_4] : memref<32x128xf32, #tpu.memory_space<vmem>>, vector<32x128xf32>
    %cst = arith.constant dense<0.000000e+00> : vector<24x128xf32>
    %37 = tpu.matmul %5, %36, %cst {dimension_numbers = #tpu.dot_dimension_numbers<[1], [0], [0], [1], [0, 0, 1, 1], [], []>, precision = #tpu.contract_precision<fp32>} : vector<24x32xf32>, vector<32x128xf32>, vector<24x128xf32> -> vector<24x128xf32>
    %c0_5 = arith.constant 0 : index
    %c0_6 = arith.constant 0 : index
    %38 = vector.load %arg4[%c0_5, %c0_6] : memref<32x128xf32, #tpu.memory_space<vmem>>, vector<32x128xf32>
    %cst_7 = arith.constant dense<0.000000e+00> : vector<24x128xf32>
    %39 = tpu.matmul %35, %38, %cst_7 {dimension_numbers = #tpu.dot_dimension_numbers<[1], [0], [0], [1], [0, 0, 1, 1], [], []>, precision = #tpu.contract_precision<fp32>} : vector<24x32xf32>, vector<32x128xf32>, vector<24x128xf32> -> vector<24x128xf32>
    %40 = arith.addf %37, %39 : vector<24x128xf32>
    %c0_8 = arith.constant 0 : index
    %c0_9 = arith.constant 0 : index
    %41 = vector.load %arg5[%c0_8, %c0_9] : memref<1x128xf32, #tpu.memory_space<vmem>>, vector<1x128xf32>
    %42 = vector.broadcast %41 : vector<1x128xf32> to vector<24x128xf32>
    %43 = arith.addf %40, %42 : vector<24x128xf32>
    %cst_10 = arith.constant 0.000000e+00 : f32
    %44 = vector.broadcast %cst_10 : f32 to vector<24x128xf32>
    %45 = arith.maximumf %43, %44 : vector<24x128xf32>
    %c0_11 = arith.constant 0 : index
    %c0_12 = arith.constant 0 : index
    %46 = vector.load %arg6[%c0_11, %c0_12] : memref<24x128xf32, #tpu.memory_space<vmem>>, vector<24x128xf32>
    tpu.vector_store %arg6[%c0_11, %c0_12], %45 {strides = array<i32>} : memref<24x128xf32, #tpu.memory_space<vmem>>, vector<24x128xf32>,
    return
  }
  func.func @transform_0(%arg0: i32) -> (i32, i32) {
    %c0_i32 = arith.constant 0 : i32
    %c0_i32_0 = arith.constant 0 : i32
    return %arg0, %c0_i32 : i32, i32
  }
  func.func @transform_1(%arg0: i32) -> (i32, i32) {
    %c0_i32 = arith.constant 0 : i32
    %c0_i32_0 = arith.constant 0 : i32
    return %arg0, %c0_i32 : i32, i32
  }
  func.func @transform_2(%arg0: i32) -> (i32, i32) {
    %c0_i32 = arith.constant 0 : i32
    %c0_i32_0 = arith.constant 0 : i32
    %c0_i32_1 = arith.constant 0 : i32
    return %c0_i32, %c0_i32_0 : i32, i32
  }
  func.func @transform_3(%arg0: i32) -> (i32, i32) {
    %c0_i32 = arith.constant 0 : i32
    %c0_i32_0 = arith.constant 0 : i32
    %c0_i32_1 = arith.constant 0 : i32
    return %c0_i32, %c0_i32_0 : i32, i32
  }
  func.func @transform_4(%arg0: i32) -> (i32, i32) {
    %c0_i32 = arith.constant 0 : i32
    %c0_i32_0 = arith.constant 0 : i32
    %c0_i32_1 = arith.constant 0 : i32
    return %c0_i32, %c0_i32_0 : i32, i32
  }
  func.func @transform_5(%arg0: i32) -> (i32, i32) {
    %c0_i32 = arith.constant 0 : i32
    %c0_i32_0 = arith.constant 0 : i32
    return %arg0, %c0_i32 : i32, i32
  }
}

</mosaic_0001>

<bundles_post_ra>
// kernel: tpu_custom_call.1
= control target key start
LH: loop header
LB: loop body
LE: loop exit
PB: predicated region body
PF: predicated region fallthrough
CT: control target
= control target key end

     0   :  { %v1790_v1 = vmov 2   ;;  %v1791_v2 = vmov 1   ;;  %s2214_s0 = inlined_call_operand.vmem [shape: s32[24,1], index: 0, kind: input, shape index: {}]   ;;  %s2215_s1 = inlined_call_operand.vmem [shape: s32[24,5], index: 1, kind: input, shape index: {}]   ;;  %s2216_s2 = inlined_call_operand.vmem [shape: f32[32,128], index: 2, kind: input, shape index: {}]   ;;  %s2217_s3 = inlined_call_operand.vmem [shape: f32[32,128], index: 3, kind: input, shape index: {}]   ;;  %s2218_s4 = inlined_call_operand.vmem [shape: f32[1,128], index: 4, kind: input, shape index: {}]   ;;  %s2219_s5 = inlined_call_operand.hbm [shape: f32[24,128], index: 5, kind: output, shape index: {}]  }
   0x1   :  { %v44_v0 = vld [vmem:[%s2215_s1] sm:$0xff]  ;;  %1750 = vset.pattern.permute.xlu1 %v1790_v1  ;;  %1749 = vset.pattern.permute.xlu0 %v1791_v2 }
   0x2   :  { %87 = vperm.xlu1 %1750, %v44_v0   ;;  %66 = vperm.xlu0 %1749, %v44_v0  }
   0x3   :  { %10 = vsyncpa [#allocation3], 0  ;;  %v1837_v3 = vld [vmem:[%s2215_s1 + $0x8] sm:$0xff]  ;;  %v1792_v4 = vmov 3   ;;  %v1793_v5 = vmov 0   ;;  %v153_v6 = vld [vmem:[%s2217_s3] sm:$0xff]  ;;  %v21_v47 = vlaneseq }
   0x4   :  { %v154_v7 = vld [vmem:[%s2217_s3 + $0x8] sm:$0xff]  ;;  %v168_v8 = vand.u32 4294901760, %v153_v6  ;;  %v46_v12 = vld [vmem:[%s2215_s1 + $0x10] sm:$0xff]  ;;  %v156_v14 = vld [vmem:[%s2217_s3 + $0x18] sm:$0xff]  ;;  %v1794_v27 = vmov 0.0|0.0   ;;  %v1795_v30 = vmov 4  }
   0x5   :  { %v171_v9 = vand.u32 4294901760, %v154_v7  ;;  %v155_v13 = vld [vmem:[%s2217_s3 + $0x10] sm:$0xff]  ;;  %v177_v18 = vand.u32 4294901760, %v156_v14  ;;  %1672 = vmatprep.subr.bf16.mxu1 %v1794_v27  ;;  %1666 = vmatprep.subr.bf16.mxu0 %v1794_v27  ;;  %vm1796_vm0 = vmmov 0   ;;  %v1797_v36 = vmov 0.0   ;;  %v23_v39 = vld [vmem:[%s2214_s0] sm:$0xff] }
   0x6   :  { %1753 = vset.pattern.permute.xlu0 %v1792_v4  ;;  %1751 = vset.pattern.permute.xlu1 %v1793_v5  ;;  %v1850_v10 = vsub.f32 %v153_v6, %v168_v8  ;;  %v174_v17 = vand.u32 4294901760, %v155_v13  ;;  %v25_v35 = vld [vmem:[%s2214_s0 + $0x10] sm:$0xff]  ;;  %v24_v40 = vld [vmem:[%s2214_s0 + $0x8] sm:$0xff]  ;;  %v1923_v48 = vand.u32 127, %v21_v47  ;;  %vm157_vm6 = vcmask 261120   ;;  %s1798_s19 = smov [#allocation2]  }
   0x7   :  { %108 = vperm.xlu0 %1753, %v44_v0   ;;  %51 = vperm.xlu1 %1751, %v1837_v3   ;;  %v1852_v11 = vsub.f32 %v154_v7, %v171_v9  ;;  %v1874_v22 = vsub.f32 %v156_v14, %v177_v18  ;;  %v1888_v37 = vpack.c.bf16 %v171_v9, %v168_v8  ;;  %s1339_s20 = sshll.u32 %s1798_s19, 4  ;;  %s1340_s20 = int_to_ptr.vmem [resolvable:$true] %s1339_s20 }
   0x8   :  { %v269_v15 = vand.u32 4294901760, %v1850_v10  ;;  %v1871_v21 = vsub.f32 %v155_v13, %v174_v17  ;;  %1487 = vmatprep.mubr.msk.f32.mxu1 %vm1796_vm0, %v1797_v36  ;;  %1470 = vmatprep.mubr.msk.f32.mxu0 %vm1796_vm0, %v1797_v36  ;;  %v1898_v38 = vpack.c.bf16 %v177_v18, %v174_v17  ;;  %p1771_p1 = scmp.lt.s32.totalorder %s1340_s20, %s1340_s20 }
   0x9   :  { %v276_v16 = vand.u32 4294901760, %v1852_v11  ;;  %v290_v26 = vand.u32 4294901760, %v1874_v22  ;;  %1668 = vmatpush3.bf16.msra.mxu0 %v1888_v37  ;;  %v1679_v41 = vpack.c.bf16 %v1852_v11, %v1850_v10 }
   0xa   :  { %v270_v19 = vsub.f32 %v1850_v10, %v269_v15  ;;  %v283_v25 = vand.u32 4294901760, %v1871_v21  ;;  %1669 = vmatprep.subr.bf16.mxu0 %v1794_v27  ;;  %v1682_v42 = vpack.c.bf16 %v1874_v22, %v1871_v21  ;;  %v1990_v10 = vld [vmem:[%s2216_s2 + $0x8] sm:$0xff] }
   0xb   :  { %1754 = vset.pattern.permute.xlu0 %v1793_v5  ;;  %1752 = vset.pattern.permute.xlu1 %v1791_v2  ;;  %v277_v20 = vsub.f32 %v1852_v11, %v276_v16  ;;  %v291_v31 = vsub.f32 %v1874_v22, %v290_v26  ;;  %v1919_v43 = vpack.c.bf16 %v276_v16, %v269_v15 }
   0xc   :  { %48 = vperm.xlu0 %1754, %v44_v0   ;;  %69 = vperm.xlu1 %1752, %v1837_v3   ;;  %v271_v23 = vand.u32 4294901760, %v270_v19  ;;  %v284_v29 = vsub.f32 %v1871_v21, %v283_v25  ;;  %v1921_v44 = vpack.c.bf16 %v290_v26, %v283_v25  ;;  %v751_v21 = vand.u32 4294901760, %v1990_v10 }
   0xd   :  { %v278_v24 = vand.u32 4294901760, %v277_v20  ;;  %v292_v33 = vand.u32 4294901760, %v291_v31  ;;  %1671 = vmatpush3.bf16.msra.mxu0 %v1898_v38 }
   0xe   :  { %v285_v32 = vand.u32 4294901760, %v284_v29  ;;  %1678 = vmatprep.subr.bf16.mxu0 %v1794_v27 }
   0xf   :  { %v1673_v28 = vpack.c.bf16 %v278_v24, %v271_v23 }
  0x10   :  { %1755 = vset.pattern.permute.xlu1 %v1790_v1  ;;  %54 = vperm.xlu0 %1754, %v46_v12   ;;  %v1676_v34 = vpack.c.bf16 %v292_v33, %v285_v32  ;;  %v1979_v32 = vld [vmem:[%s2216_s2] sm:$0xff] }
  0x11   :  { %90 = vperm.xlu1 %1755, %v1837_v3   ;;  %1674 = vmatpush3.bf16.msra.mxu1 %v1673_v28 }
  0x12   :  { %1675 = vmatprep.subr.bf16.mxu1 %v1794_v27 }
  0x14   :  { %1759 = vset.pattern.permute.xlu0 %v1790_v1 }
  0x15   :  { %1756 = vset.pattern.permute.xlu1 %v1795_v30  ;;  %93 = vperm.xlu0 %1759, %v46_v12  }
  0x16   :  { %129 = vperm.xlu1 %1756, %v44_v0   ;;  %1677 = vmatpush3.bf16.msra.mxu1 %v1676_v34 }
  0x17   :  { %1684 = vmatprep.subr.bf16.mxu1 %v1794_v27 }
  0x19   :  { %1762 = vset.pattern.permute.xlu0 %v1795_v30 }
  0x1a   :  { %1757 = vset.pattern.permute.xlu1 %v1791_v2  ;;  %135 = vperm.xlu0 %1762, %v46_v12  }
  0x1b   :  { %72 = vperm.xlu1 %1757, %v46_v12  }
  0x1e   :  { %1764 = vset.pattern.permute.xlu0 %v1793_v5 }
  0x1f   :  { %1758 = vset.pattern.permute.xlu1 %v1792_v4  ;;  %33 = vperm.xlu0 %1764, %v25_v35  }
  0x20   :  { %111 = vperm.xlu1 %1758, %v1837_v3  }
  0x23   :  { %1765 = vset.pattern.permute.xlu0 %v1795_v30 }
  0x24   :  { %1760 = vset.pattern.permute.xlu1 %v1795_v30 }
  0x25   :  { %132 = vperm.xlu1 %1760, %v1837_v3  }
  0x29   :  { %1761 = vset.pattern.permute.xlu1 %v1792_v4 }
  0x2a   :  { %114 = vperm.xlu1 %1761, %v46_v12  }
  0x2e   :  { %1763 = vset.pattern.permute.xlu1 %v1793_v5 }
  0x2f   :  { %27 = vperm.xlu1 %1763, %v23_v39  }
  0x33   :  { %30 = vperm.xlu1 %1763, %v24_v40  }
  0x81   :  { %v88_v45 = vpop.permute.xlu1 %87  ;;  %v67_v46 = vpop.permute.xlu0 %66 }
  0x82   :  { %vm74_vm1 = vcmp.eq.s32.totalorder %v67_v46, %v1923_v48  ;;  %vm95_vm3 = vcmp.eq.s32.totalorder %v88_v45, %v1923_v48  ;;  %v2004_v45 = vld [vmem:[%s2216_s2 + $0x10] sm:$0xff]  ;;  %v2009_v46 = vld [vmem:[%s2216_s2 + $0x18] sm:$0xff] }
  0x83   :  { %v1356_v51 = vsel %vm74_vm1, 1.0, %v1797_v36  ;;  %v1359_v57 = vsel %vm95_vm3, 1.0, %v1797_v36 }
  0x86   :  { %v52_v49 = vpop.permute.xlu1 %51  ;;  %v109_v50 = vpop.permute.xlu0 %108 }
  0x87   :  { %vm116_vm4 = vcmp.eq.s32.totalorder %v109_v50, %v1923_v48  ;;  %vm57_vm8 = vcmp.eq.s32.totalorder %v52_v49, %v1923_v48 }
  0x88   :  { %v1362_v59 = vsel %vm116_vm4, 1.0, %v1797_v36  ;;  %v1354_v6 = vsel %vm57_vm8, 1.0, %v1797_v36 }
  0x8b   :  { %v49_v52 = vpop.permute.xlu0 %48  ;;  %v70_v53 = vpop.permute.xlu1 %69 }
  0x8c   :  { %vm56_vm2 = vcmp.eq.s32.totalorder %v49_v52, %v1923_v48  ;;  %vm75_vm7 = vcmp.eq.s32.totalorder %v70_v53, %v1923_v48  ;;  %v2022_v52 = vsub.f32 %v1990_v10, %v751_v21  ;;  %v754_v53 = vand.u32 4294901760, %v2004_v45 }
  0x8d   :  { %v1353_v54 = vsel %vm56_vm2, 1.0, %v1797_v36  ;;  %v1357_v5 = vsel %vm75_vm7, 1.0, %v1797_v36 }
  0x8e   :  { %v83_v55 = vadd.f32 %v1356_v51, %v1353_v54  ;;  %v84_v12 = vadd.f32 %v1357_v5, %v1354_v6  ;;  %v757_v54 = vand.u32 4294901760, %v2009_v46 }
  0x8f   :  { %v55_v3 = vpop.permute.xlu0 %54 }
  0x90   :  { %v91_v56 = vpop.permute.xlu1 %90  ;;  %v104_v58 = vadd.f32 %v1359_v57, %v83_v55  ;;  %vm58_vm10 = vcmp.eq.s32.totalorder %v55_v3, %v1923_v48 }
  0x91   :  { %vm96_vm9 = vcmp.eq.s32.totalorder %v91_v56, %v1923_v48  ;;  %v1355_v17 = vsel %vm58_vm10, 1.0, %v1797_v36 }
  0x92   :  { %v125_v61 = vadd.f32 %v1362_v59, %v104_v58  ;;  %v1360_v9 = vsel %vm96_vm9, 1.0, %v1797_v36  ;;  %v856_v59 = vand.u32 4294901760, %v2022_v52 }
  0x93   :  { %v105_v16 = vadd.f32 %v1360_v9, %v84_v12 }
  0x94   :  { %v94_v13 = vpop.permute.xlu0 %93 }
  0x95   :  { %v130_v60 = vpop.permute.xlu1 %129  ;;  %vm97_vm13 = vcmp.eq.s32.totalorder %v94_v13, %v1923_v48 }
  0x96   :  { %vm137_vm5 = vcmp.eq.s32.totalorder %v130_v60, %v1923_v48  ;;  %v1361_v28 = vsel %vm97_vm13, 1.0, %v1797_v36  ;;  %v2037_v60 = vsub.f32 %v2004_v45, %v754_v53 }
  0x97   :  { %v1365_v62 = vsel %vm137_vm5, 1.0, %v1797_v36 }
  0x98   :  { %v146_v63 = vadd.f32 %v1365_v62, %v125_v61  ;;  %v2042_v61 = vsub.f32 %v2009_v46, %v757_v54  ;;  %v863_v3 = vand.u32 4294901760, %v2037_v60 }
  0x99   :  { %v136_v24 = vpop.permute.xlu0 %135 }
  0x9a   :  { %v159_v0 = vsel %vm157_vm6, %v146_v63, 0  ;;  %v73_v1 = vpop.permute.xlu1 %72  ;;  %vm139_vm15 = vcmp.eq.s32.totalorder %v136_v24, %v1923_v48  ;;  %v870_v5 = vand.u32 4294901760, %v2042_v61 }
  0x9b   :  { %v1937_v2 = vand.u32 4294901760, %v159_v0  ;;  %vm76_vm11 = vcmp.eq.s32.totalorder %v73_v1, %v1923_v48  ;;  %v1367_v35 = vsel %vm139_vm15, 1.0, %v1797_v36  ;;  %v857_v1 = vsub.f32 %v2022_v52, %v856_v59 }
  0x9c   :  { %v1358_v18 = vsel %vm76_vm11, 1.0, %v1797_v36  ;;  %v871_v9 = vsub.f32 %v2042_v61, %v870_v5 }
  0x9d   :  { %v1942_v4 = vsub.f32 %v159_v0, %v1937_v2  ;;  %1488 = vmatmul.mubr.f32.vlgmr.msra.gmra.mrb[0].mxu1 %v1937_v2  ;;  %v85_v25 = vadd.f32 %v1358_v18, %v1355_v17 }
  0x9e   :  { %1490 = vmatprep.mubr.msk.f32.mxu1 %vm1796_vm0, %v1797_v36  ;;  %1686 = vmatpush3.bf16.msra.mxu1 %v1888_v37 }
  0x9f   :  { %v112_v7 = vpop.permute.xlu1 %111  ;;  %v238_v8 = vand.u32 4294901760, %v1942_v4  ;;  %1687 = vmatprep.subr.bf16.mxu1 %v1794_v27  ;;  %v106_v33 = vadd.f32 %v1361_v28, %v85_v25 }
  0xa0   :  { %vm117_vm12 = vcmp.eq.s32.totalorder %v112_v7, %v1923_v48  ;;  %v858_v7 = vand.u32 4294901760, %v857_v1 }
  0xa1   :  { %v239_v14 = vsub.f32 %v1942_v4, %v238_v8  ;;  %v1363_v15 = vsel %vm117_vm12, 1.0, %v1797_v36 }
  0xa2   :  { %1689 = vmatpush3.bf16.msra.mxu1 %v1898_v38  ;;  %v126_v23 = vadd.f32 %v1363_v15, %v105_v16  ;;  %v34_v15 = vpop.permute.xlu0 %33 }
  0xa3   :  { %v240_v19 = vand.u32 4294901760, %v239_v14  ;;  %1696 = vmatprep.subr.bf16.mxu1 %v1794_v27  ;;  %v872_v14 = vand.u32 4294901760, %v871_v9  ;;  %vm37_vm4 = vcmp.eq.s32.totalorder %v34_v15, %v1923_v48 }
  0xa4   :  { %v133_v20 = vpop.permute.xlu1 %132 }
  0xa5   :  { %vm138_vm14 = vcmp.eq.s32.totalorder %v133_v20, %v1923_v48  ;;  %1471 = vmatmul.mubr.f32.vlgmr.msra.gmra.mrb[0].mxu0 %v240_v19  ;;  %v2111_v20 = vsel %vm37_vm4, 1.0, %v1797_v36 }
  0xa6   :  { %v1366_v26 = vsel %vm138_vm14, 1.0, %v1797_v36  ;;  %1473 = vmatprep.mubr.msk.f32.mxu0 %vm1796_vm0, %v1797_v36  ;;  %1680 = vmatpush3.bf16.msra.mxu0 %v1679_v41  ;;  %v748_v41 = vand.u32 4294901760, %v1979_v32 }
  0xa7   :  { %v147_v29 = vadd.f32 %v1366_v26, %v126_v23  ;;  %1681 = vmatprep.subr.bf16.mxu0 %v1794_v27 }
  0xa8   :  { %v2015_v50 = vsub.f32 %v1979_v32, %v748_v41  ;;  %v1703_v17 = vpack.c.bf16 %v751_v21, %v748_v41 }
  0xa9   :  { %v162_v30 = vsel %vm157_vm6, %v147_v29, 0  ;;  %v115_v31 = vpop.permute.xlu1 %114 }
  0xaa   :  { %v1981_v34 = vand.u32 4294901760, %v162_v30  ;;  %vm118_vm1 = vcmp.eq.s32.totalorder %v115_v31, %v1923_v48  ;;  %1683 = vmatpush3.bf16.msra.mxu0 %v1682_v42  ;;  %v849_v57 = vand.u32 4294901760, %v2015_v50  ;;  %v1715_v29 = vpack.c.bf16 %v2022_v52, %v2015_v50 }
  0xab   :  { %v1364_v11 = vsel %vm118_vm1, 1.0, %v1797_v36  ;;  %1690 = vmatprep.subr.bf16.mxu0 %v1794_v27 }
  0xac   :  { %v247_v39 = vsub.f32 %v162_v30, %v1981_v34  ;;  %v127_v40 = vadd.f32 %v1364_v11, %v106_v33  ;;  %1491 = vmatmul.mubr.f32.gmra.mrb[2].mxu1 %v1981_v34  ;;  %v850_v63 = vsub.f32 %v2015_v50, %v849_v57  ;;  %v1718_v33 = vpack.c.bf16 %v2042_v61, %v2037_v60 }
  0xad   :  { %1493 = vmatprep.mubr.msk.f32.mxu1 %vm1796_vm0, %v1797_v36 }
  0xae   :  { %v148_v22 = vadd.f32 %v1367_v35, %v127_v40  ;;  %v248_v42 = vand.u32 4294901760, %v247_v39  ;;  %v28_v6 = vpop.permute.xlu1 %27  ;;  %v1727_v35 = vpack.c.bf16 %v856_v59, %v849_v57 }
  0xaf   :  { %vm35_vm2 = vcmp.eq.s32.totalorder %v28_v6, %v1923_v48 }
  0xb0   :  { %v165_v47 = vsel %vm157_vm6, %v148_v22, 0  ;;  %v249_v49 = vsub.f32 %v247_v39, %v248_v42 }
  0xb1   :  { %v2017_v51 = vand.u32 4294901760, %v165_v47 }
  0xb2   :  { %v250_v55 = vand.u32 4294901760, %v249_v49  ;;  %v31_v12 = vpop.permute.xlu1 %30 }
  0xb3   :  { %v257_v56 = vsub.f32 %v165_v47, %v2017_v51  ;;  %1494 = vmatmul.mubr.f32.gmra.mrb[4].mxu1 %v2017_v51  ;;  %vm36_vm3 = vcmp.eq.s32.totalorder %v31_v12, %v1923_v48  ;;  %v1706_v48 = vpack.c.bf16 %v757_v54, %v754_v53 }
  0xb4   :  { %1474 = vmatmul.mubr.f32.gmra.mrb[2].mxu0 %v250_v55  ;;  %1521 = vmatprep.mubr.msk.f32.mxu1 %vm1796_vm0, %v1797_v36 }
  0xb5   :  { %1476 = vmatprep.mubr.msk.f32.mxu0 %vm1796_vm0, %v1797_v36  ;;  %v258_v58 = vand.u32 4294901760, %v257_v56 }
  0xb7   :  { %1522 = vmatmul.mubr.f32.vlgmr.msra.gmra.mrb[6].mxu1 %v238_v8  ;;  %v259_v62 = vsub.f32 %v257_v56, %v258_v58  ;;  %v864_v8 = vsub.f32 %v2037_v60, %v863_v3 }
  0xb8   :  { %1524 = vmatprep.mubr.msk.f32.mxu1 %vm1796_vm0, %v1797_v36  ;;  %1698 = vmatpush3.bf16.msra.mxu1 %v1888_v37  ;;  %v851_v37 = vand.u32 4294901760, %v850_v63 }
  0xb9   :  { %v260_v0 = vand.u32 4294901760, %v259_v62  ;;  %1699 = vmatprep.subr.bf16.mxu1 %v1794_v27  ;;  %v865_v13 = vand.u32 4294901760, %v864_v8 }
  0xbb   :  { %1477 = vmatmul.mubr.f32.gmra.mrb[4].mxu0 %v260_v0  ;;  %1525 = vmatmul.mubr.f32.gmra.mrb[8].mxu1 %v248_v42 }
  0xbc   :  { %1504 = vmatprep.mubr.msk.f32.mxu0 %vm1796_vm0, %v1797_v36  ;;  %1527 = vmatprep.mubr.msk.f32.mxu1 %vm1796_vm0, %v1797_v36 }
  0xbd   :  { %1701 = vmatpush3.bf16.msra.mxu1 %v1898_v38  ;;  %v1709_v38 = vpack.c.bf16 %v858_v7, %v851_v37 }
  0xbe   :  { %1708 = vmatprep.subr.bf16.mxu1 %v1794_v27 }
  0xbf   :  { %1505 = vmatmul.mubr.f32.vlgmr.msra.gmra.mrb[6].mxu0 %v1942_v4  ;;  %1528 = vmatmul.mubr.f32.gmra.mrb[10].mxu1 %v258_v58  ;;  %v2080_v4 = vsel %vm35_vm2, 1.0, %v1797_v36 }
  0xc0   :  { %1692 = vmatpush3.bf16.msra.mxu0 %v1919_v43  ;;  %1507 = vmatprep.mubr.msk.f32.mxu0 %vm1796_vm0, %v1797_v36  ;;  %v1712_v43 = vpack.c.bf16 %v872_v14, %v865_v13  ;;  %v739_v16 = vsel %vm157_vm6, %v2080_v4, 0 }
  0xc1   :  { %1555 = vmatprep.mubr.msk.f32.mxu1 %vm1796_vm0, %v1797_v36  ;;  %1693 = vmatprep.subr.bf16.mxu0 %v1794_v27  ;;  %v817_v18 = vsub.f32 %v739_v16, %v739_v16 }
  0xc3   :  { %1508 = vmatmul.mubr.f32.gmra.mrb[8].mxu0 %v247_v39  ;;  %1556 = vmatmul.mubr.f32.vlgmr.msra.gmra.mrb[12].mxu1 %v1937_v2  ;;  %v818_v23 = vand.u32 4294901760, %v817_v18  ;;  %v1730_v39 = vpack.c.bf16 %v870_v5, %v863_v3 }
  0xc4   :  { %1695 = vmatpush3.bf16.msra.mxu0 %v1921_v44  ;;  %1510 = vmatprep.mubr.msk.f32.mxu0 %vm1796_vm0, %v1797_v36  ;;  %v2094_v44 = vsel %vm36_vm3, 1.0, %v1797_v36 }
  0xc5   :  { %1558 = vmatprep.mubr.msk.f32.mxu1 %vm1796_vm0, %v1797_v36  ;;  %1710 = vmatpush3.bf16.msra.mxu1 %v1709_v38  ;;  %v742_v19 = vsel %vm157_vm6, %v2094_v44, 0  ;;  %v819_v25 = vsub.f32 %v817_v18, %v818_v23 }
  0xc6   :  { %1702 = vmatprep.subr.bf16.mxu0 %v1794_v27  ;;  %1711 = vmatprep.subr.bf16.mxu1 %v1794_v27  ;;  %v827_v24 = vsub.f32 %v742_v19, %v742_v19 }
  0xc7   :  { %1511 = vmatmul.mubr.f32.gmra.mrb[10].mxu0 %v257_v56  ;;  %1559 = vmatmul.mubr.f32.gmra.mrb[14].mxu1 %v1981_v34  ;;  %v820_v30 = vand.u32 4294901760, %v819_v25 }
  0xc8   :  { %1538 = vmatprep.mubr.msk.f32.mxu0 %vm1796_vm0, %v1797_v36  ;;  %1561 = vmatprep.mubr.msk.f32.mxu1 %vm1796_vm0, %v1797_v36  ;;  %v828_v28 = vand.u32 4294901760, %v827_v24 }
  0xc9   :  { %1713 = vmatpush3.bf16.msra.mxu1 %v1712_v43 }
  0xca   :  { %1720 = vmatprep.subr.bf16.mxu1 %v1794_v27  ;;  %v829_v31 = vsub.f32 %v827_v24, %v828_v28 }
  0xcb   :  { %1539 = vmatmul.mubr.f32.vlgmr.msra.gmra.mrb[12].mxu0 %v1937_v2  ;;  %1562 = vmatmul.mubr.f32.gmra.mrb[16].mxu1 %v2017_v51  ;;  %v745_v2 = vsel %vm157_vm6, %v2111_v20, 0 }
  0xcc   :  { %1704 = vmatpush3.bf16.msra.mxu0 %v1703_v17  ;;  %1541 = vmatprep.mubr.msk.f32.mxu0 %vm1796_vm0, %v1797_v36  ;;  %v837_v26 = vsub.f32 %v745_v2, %v745_v2 }
  0xcd   :  { %1589 = vmatprep.mubr.msk.f32.mxu1 %vm1796_vm0, %v1797_v36  ;;  %1705 = vmatprep.subr.bf16.mxu0 %v1794_v27 }
  0xce   :  { %v838_v32 = vand.u32 4294901760, %v837_v26 }
  0xcf   :  { %1542 = vmatmul.mubr.f32.gmra.mrb[14].mxu0 %v1981_v34  ;;  %1590 = vmatmul.mubr.msk.f32.vlgmr.msra.gmra.mrb[18].mxu1 %vm157_vm6, %v2080_v4  ;;  %v830_v34 = vand.u32 4294901760, %v829_v31 }
  0xd0   :  { %1707 = vmatpush3.bf16.msra.mxu0 %v1706_v48  ;;  %1544 = vmatprep.mubr.msk.f32.mxu0 %vm1796_vm0, %v1797_v36  ;;  %v839_v10 = vsub.f32 %v837_v26, %v838_v32 }
  0xd1   :  { %1592 = vmatprep.mubr.msk.f32.mxu1 %vm1796_vm0, %v1797_v36  ;;  %1722 = vmatpush3.bf16.msra.mxu1 %v1703_v17 }
  0xd2   :  { %1714 = vmatprep.subr.bf16.mxu0 %v1794_v27  ;;  %1723 = vmatprep.subr.bf16.mxu1 %v1794_v27  ;;  %v840_v11 = vand.u32 4294901760, %v839_v10 }
  0xd3   :  { %1545 = vmatmul.mubr.f32.gmra.mrb[16].mxu0 %v2017_v51  ;;  %1593 = vmatmul.mubr.msk.f32.gmra.mrb[20].mxu1 %vm157_vm6, %v2094_v44 }
  0xd4   :  { %1572 = vmatprep.mubr.msk.f32.mxu0 %vm1796_vm0, %v1797_v36  ;;  %1595 = vmatprep.mubr.msk.f32.mxu1 %vm1796_vm0, %v1797_v36 }
  0xd5   :  { %1725 = vmatpush3.bf16.msra.mxu1 %v1706_v48 }
  0xd6   :  { %1732 = vmatprep.subr.bf16.mxu1 %v1794_v27 }
  0xd7   :  { %1573 = vmatmul.mubr.f32.vlgmr.msra.gmra.mrb[18].mxu0 %v820_v30  ;;  %1596 = vmatmul.mubr.msk.f32.gmra.mrb[22].mxu1 %vm157_vm6, %v2111_v20 }
  0xd8   :  { %1716 = vmatpush3.bf16.msra.mxu0 %v1715_v29  ;;  %1575 = vmatprep.mubr.msk.f32.mxu0 %vm1796_vm0, %v1797_v36 }
  0xd9   :  { %1623 = vmatprep.mubr.msk.f32.mxu1 %vm1796_vm0, %v1797_v36  ;;  %1717 = vmatprep.subr.bf16.mxu0 %v1794_v27 }
  0xdb   :  { %1576 = vmatmul.mubr.f32.gmra.mrb[20].mxu0 %v830_v34  ;;  %1624 = vmatmul.mubr.f32.vlgmr.msra.gmra.mrb[24].mxu1 %v818_v23 }
  0xdc   :  { %1719 = vmatpush3.bf16.msra.mxu0 %v1718_v33  ;;  %1578 = vmatprep.mubr.msk.f32.mxu0 %vm1796_vm0, %v1797_v36 }
  0xdd   :  { %1626 = vmatprep.mubr.msk.f32.mxu1 %vm1796_vm0, %v1797_v36  ;;  %1734 = vmatpush3.bf16.msra.mxu1 %v1703_v17 }
  0xde   :  { %1726 = vmatprep.subr.bf16.mxu0 %v1794_v27  ;;  %1735 = vmatprep.subr.bf16.mxu1 %v1794_v27 }
  0xdf   :  { %1579 = vmatmul.mubr.f32.gmra.mrb[22].mxu0 %v840_v11  ;;  %1627 = vmatmul.mubr.f32.gmra.mrb[26].mxu1 %v828_v28 }
  0xe0   :  { %1606 = vmatprep.mubr.msk.f32.mxu0 %vm1796_vm0, %v1797_v36  ;;  %1629 = vmatprep.mubr.msk.f32.mxu1 %vm1796_vm0, %v1797_v36 }
  0xe1   :  { %1737 = vmatpush3.bf16.msra.mxu1 %v1706_v48 }
  0xe3   :  { %1607 = vmatmul.mubr.f32.vlgmr.msra.gmra.mrb[24].mxu0 %v817_v18  ;;  %1630 = vmatmul.mubr.f32.gmra.mrb[28].mxu1 %v838_v32 }
  0xe4   :  { %1728 = vmatpush3.bf16.msra.mxu0 %v1727_v35  ;;  %1609 = vmatprep.mubr.msk.f32.mxu0 %vm1796_vm0, %v1797_v36 }
  0xe5   :  { %1657 = vmatprep.mubr.msk.f32.mxu1 %vm1796_vm0, %v1797_v36  ;;  %1729 = vmatprep.subr.bf16.mxu0 %v1794_v27 }
  0xe7   :  { %1610 = vmatmul.mubr.f32.gmra.mrb[26].mxu0 %v827_v24  ;;  %1658 = vmatmul.mubr.msk.f32.vlgmr.msra.gmra.mrb[30].mxu1 %vm157_vm6, %v2080_v4 }
  0xe8   :  { %1731 = vmatpush3.bf16.msra.mxu0 %v1730_v39  ;;  %1612 = vmatprep.mubr.msk.f32.mxu0 %vm1796_vm0, %v1797_v36 }
  0xe9   :  { %1660 = vmatprep.mubr.msk.f32.mxu1 %vm1796_vm0, %v1797_v36 }
  0xeb   :  { %1613 = vmatmul.mubr.f32.gmra.mrb[28].mxu0 %v837_v26  ;;  %1661 = vmatmul.mubr.msk.f32.gmra.mrb[32].mxu1 %vm157_vm6, %v2094_v44 }
  0xec   :  { %1640 = vmatprep.mubr.msk.f32.mxu0 %vm1796_vm0, %v1797_v36  ;;  %1663 = vmatprep.mubr.msk.f32.mxu1 %vm1796_vm0, %v1797_v36 }
  0xef   :  { %1641 = vmatmul.mubr.msk.f32.vlgmr.msra.gmra.mrb[30].mxu0 %vm157_vm6, %v2080_v4  ;;  %1664 = vmatmul.mubr.msk.f32.gmra.mrb[34].mxu1 %vm157_vm6, %v2111_v20 }
  0xf0   :  { %1643 = vmatprep.mubr.msk.f32.mxu0 %vm1796_vm0, %v1797_v36 }
  0xf3   :  { %1644 = vmatmul.mubr.msk.f32.gmra.mrb[32].mxu0 %vm157_vm6, %v2094_v44 }
  0xf4   :  { %1646 = vmatprep.mubr.msk.f32.mxu0 %vm1796_vm0, %v1797_v36 }
  0xf7   :  { %1647 = vmatmul.mubr.msk.f32.gmra.mrb[34].mxu0 %vm157_vm6, %v2111_v20 }
 0x170   :  { %v353_v27 = vpop.f32.mrb[0].mxu1 }
 0x171   :  { %v1489_v40 = vpop.f32.mrb[1].mxu1 }
 0x178   :  { %v242_v41 = vpop.f32.mrb[0].mxu0 }
 0x179   :  { %v354_v21 = vadd.f32 %v353_v27, %v242_v41  ;;  %v1472_v22 = vpop.f32.mrb[1].mxu0 }
 0x17f   :  { %v359_v42 = vpop.f32.mrb[2].mxu1 }
 0x180   :  { %v1492_v45 = vpop.f32.mrb[3].mxu1 }
 0x186   :  { %v365_v46 = vpop.f32.mrb[4].mxu1 }
 0x187   :  { %v252_v47 = vpop.f32.mrb[2].mxu0  ;;  %v1495_v49 = vpop.f32.mrb[5].mxu1 }
 0x188   :  { %v360_v50 = vadd.f32 %v359_v42, %v252_v47  ;;  %v1475_v51 = vpop.f32.mrb[3].mxu0 }
 0x18a   :  { %v536_v52 = vpop.f32.mrb[6].mxu1 }
 0x18b   :  { %v1523_v53 = vpop.f32.mrb[7].mxu1 }
 0x18e   :  { %v262_v54 = vpop.f32.mrb[4].mxu0  ;;  %v544_v55 = vpop.f32.mrb[8].mxu1 }
 0x18f   :  { %v366_v36 = vadd.f32 %v365_v46, %v262_v54  ;;  %v1478_v56 = vpop.f32.mrb[5].mxu0  ;;  %v1526_v57 = vpop.f32.mrb[9].mxu1 }
 0x192   :  { %v445_v58 = vpop.f32.mrb[6].mxu0  ;;  %v552_v59 = vpop.f32.mrb[10].mxu1 }
 0x193   :  { %v446_v60 = vadd.f32 %v445_v58, %v354_v21  ;;  %v1506_v61 = vpop.f32.mrb[7].mxu0  ;;  %v1529_v62 = vpop.f32.mrb[11].mxu1 }
 0x195   :  { %v537_v63 = vadd.f32 %v536_v52, %v446_v60 }
 0x196   :  { %v452_v0 = vpop.f32.mrb[8].mxu0  ;;  %v722_v1 = vpop.f32.mrb[12].mxu1 }
 0x197   :  { %v453_v3 = vadd.f32 %v452_v0, %v360_v50  ;;  %v1509_v5 = vpop.f32.mrb[9].mxu0  ;;  %v1557_v6 = vpop.f32.mrb[13].mxu1 }
 0x199   :  { %v545_v37 = vadd.f32 %v544_v55, %v453_v3 }
 0x19a   :  { %v459_v7 = vpop.f32.mrb[10].mxu0  ;;  %v728_v8 = vpop.f32.mrb[14].mxu1 }
 0x19b   :  { %v460_v9 = vadd.f32 %v459_v7, %v366_v36  ;;  %v1512_v38 = vpop.f32.mrb[11].mxu0  ;;  %v1560_v12 = vpop.f32.mrb[15].mxu1 }
 0x19d   :  { %v553_v13 = vadd.f32 %v552_v59, %v460_v9 }
 0x19e   :  { %v635_v14 = vpop.f32.mrb[12].mxu0  ;;  %v734_v4 = vpop.f32.mrb[16].mxu1 }
 0x19f   :  { %v636_v43 = vadd.f32 %v635_v14, %v537_v63  ;;  %v1540_v15 = vpop.f32.mrb[13].mxu0  ;;  %v1563_v16 = vpop.f32.mrb[17].mxu1 }
 0x1a1   :  { %v723_v44 = vadd.f32 %v722_v1, %v636_v43 }
 0x1a2   :  { %v641_v17 = vpop.f32.mrb[14].mxu0  ;;  %v933_v18 = vpop.f32.mrb[18].mxu1 }
 0x1a3   :  { %v642_v19 = vadd.f32 %v641_v17, %v545_v37  ;;  %v1543_v20 = vpop.f32.mrb[15].mxu0  ;;  %v1591_v48 = vpop.f32.mrb[19].mxu1 }
 0x1a5   :  { %v729_v23 = vadd.f32 %v728_v8, %v642_v19  ;;  %v1377_v8 = vld [vmem:[%s2218_s4] ss:$0 sm:$0xff]  ;;  %s1766_s4 = scalar_lea.vmem %s1340_s20, 384 }
 0x1a6   :  { %v647_v24 = vpop.f32.mrb[16].mxu0  ;;  %v939_v2 = vpop.f32.mrb[20].mxu1  ;;  %p1767_p0 = scmp.ne.s32.totalorder %s1340_s20, %s1766_s4  ;;  %p1772_p2 = scmp.lt.s32.totalorder %s1766_s4, %s1766_s4 }
 0x1a7   :  { %v648_v25 = vadd.f32 %v647_v24, %v553_v13  ;;  %v1546_v26 = vpop.f32.mrb[17].mxu0  ;;  %v1594_v28 = vpop.f32.mrb[21].mxu1 }
 0x1a8   :  { %p1773_p3 = por %p1772_p2, %p1771_p1 }
 0x1a9   :  { %v735_v29 = vadd.f32 %v734_v4, %v648_v25 }
 0x1aa   :  { %v822_v30 = vpop.f32.mrb[18].mxu0  ;;  %v945_v31 = vpop.f32.mrb[22].mxu1  ;;  %p1774_p4 = pnand %p1773_p3, %p1767_p0 }
 0x1ab   :  { %v823_v32 = vadd.f32 %v822_v30, %v723_v44  ;;  %v1574_v33 = vpop.f32.mrb[19].mxu0  ;;  %v1597_v34 = vpop.f32.mrb[23].mxu1 }
 0x1ad   :  { %v934_v10 = vadd.f32 %v933_v18, %v823_v32 }
 0x1ae   :  { %v832_v11 = vpop.f32.mrb[20].mxu0  ;;  %v1116_v35 = vpop.f32.mrb[24].mxu1 }
 0x1af   :  { %v833_v39 = vadd.f32 %v832_v11, %v729_v23  ;;  %v1577_v27 = vpop.f32.mrb[21].mxu0  ;;  %v1625_v40 = vpop.f32.mrb[25].mxu1 }
 0x1b1   :  { %v940_v41 = vadd.f32 %v939_v2, %v833_v39 }
 0x1b2   :  { %v842_v21 = vpop.f32.mrb[22].mxu0  ;;  %v1124_v22 = vpop.f32.mrb[26].mxu1 }
 0x1b3   :  { %v843_v42 = vadd.f32 %v842_v21, %v735_v29  ;;  %v1580_v45 = vpop.f32.mrb[23].mxu0  ;;  %v1628_v46 = vpop.f32.mrb[27].mxu1 }
 0x1b5   :  { %v946_v47 = vadd.f32 %v945_v31, %v843_v42 }
 0x1b6   :  { %v1025_v49 = vpop.f32.mrb[24].mxu0  ;;  %v1132_v50 = vpop.f32.mrb[28].mxu1 }
 0x1b7   :  { %v1026_v51 = vadd.f32 %v1025_v49, %v934_v10  ;;  %v1608_v52 = vpop.f32.mrb[25].mxu0  ;;  %v1631_v53 = vpop.f32.mrb[29].mxu1 }
 0x1b9   :  { %v1117_v54 = vadd.f32 %v1116_v35, %v1026_v51 }
 0x1ba   :  { %v1032_v55 = vpop.f32.mrb[26].mxu0  ;;  %v1302_v36 = vpop.f32.mrb[30].mxu1 }
 0x1bb   :  { %v1033_v56 = vadd.f32 %v1032_v55, %v940_v41  ;;  %v1611_v57 = vpop.f32.mrb[27].mxu0  ;;  %v1659_v58 = vpop.f32.mrb[31].mxu1 }
 0x1bd   :  { %v1125_v59 = vadd.f32 %v1124_v22, %v1033_v56 }
 0x1be   :  { %v1039_v60 = vpop.f32.mrb[28].mxu0  ;;  %v1308_v61 = vpop.f32.mrb[32].mxu1 }
 0x1bf   :  { %v1040_v62 = vadd.f32 %v1039_v60, %v946_v47  ;;  %v1614_v63 = vpop.f32.mrb[29].mxu0  ;;  %v1662_v0 = vpop.f32.mrb[33].mxu1 }
 0x1c1   :  { %v1133_v1 = vadd.f32 %v1132_v50, %v1040_v62 }
 0x1c2   :  { %v1215_v3 = vpop.f32.mrb[30].mxu0  ;;  %v1314_v5 = vpop.f32.mrb[34].mxu1 }
 0x1c3   :  { %v1216_v6 = vadd.f32 %v1215_v3, %v1117_v54  ;;  %v1642_v37 = vpop.f32.mrb[31].mxu0  ;;  %v1665_v7 = vpop.f32.mrb[35].mxu1 }
 0x1c5   :  { %v1303_v9 = vadd.f32 %v1302_v36, %v1216_v6 }
 0x1c6   :  { %v1221_v38 = vpop.f32.mrb[32].mxu0 }
 0x1c7   :  { %v1325_v12 = vadd.f32 %v1377_v8, %v1303_v9  ;;  %v1222_v13 = vadd.f32 %v1221_v38, %v1125_v59  ;;  %v1645_v14 = vpop.f32.mrb[33].mxu0 }
 0x1c9   :  { %v1328_v4 = vmax.f32 %v1325_v12, 0.0  ;;  %v1309_v43 = vadd.f32 %v1308_v61, %v1222_v13 }
 0x1ca   :  { %v1227_v15 = vpop.f32.mrb[34].mxu0 }
 0x1cb   :  { %1331 = vst [vmem:[#allocation2] sm:$0xff] %v1328_v4  ;;  %v1326_v16 = vadd.f32 %v1377_v8, %v1309_v43  ;;  %v1228_v44 = vadd.f32 %v1227_v15, %v1133_v1  ;;  %v1648_v17 = vpop.f32.mrb[35].mxu0 }
 0x1cd   :  { %v1329_v18 = vmax.f32 %v1326_v16, 0.0  ;;  %v1315_v19 = vadd.f32 %v1314_v5, %v1228_v44 }
 0x1cf   :  { %1332 = vst [vmem:[#allocation2 + $0x8] sm:$0xff] %v1329_v18  ;;  %v1327_v20 = vadd.f32 %v1377_v8, %v1315_v19 }
 0x1d1   :  { %v1330_v48 = vmax.f32 %v1327_v20, 0.0 }
 0x1d3   :  { %1333 = vst [vmem:[#allocation2 + $0x10] sm:$0xff] %v1330_v48 }
 0x1d4   :  { %1777 = shalt.err (!%p1774_p4)
}
 0x1d5   :  { %s1778_s23 = scalar_lea.hbm %s2219_s5, 384 }
 0x1d6   :  { %p1779_p5 = scmp.ne.s32.totalorder %s2219_s5, %s1778_s23  ;;  %p1782_p6 = scmp.lt.u32.totalorder %s1778_s23, %s2219_s5 }
 0x1d8   :  { %p1784_p7 = pnand %p1782_p6, %p1779_p5 }
 0x1da   :  { %1787 = shalt.err (!%p1784_p7)
}
 0x1db   :  { %s1799_s28 = smov 128   ;;  %s1800_s29 = smov 8  }
 0x1dc   :  { %1345 = dma.vmem_to_hbm [thread:$0]  %s1340_s20, 384, %s2219_s5, [#allocation3], %s1799_s28, %s1799_s28, %s1800_s29  }
 0x1dd   :  { %1788 = dma.done.wait [#allocation3], 384  }
 0x1de   :  { %1789 = vsyncadd [#allocation3], 4294966912 }
 0x1df   :  { %1349 = vsyncpa [#allocation3], 1 }

</bundles_post_ra>
